<compile_context>
chip_gen: v7x
topology: tpu7x:2x2x1
jax: 0.10.0
libtpu: 0.0.40
codegen_flags: <defaults>
</compile_context>

<pallas_src>
import functools

import jax
import jax.numpy as jnp
from jax.experimental import pallas as pl
from jax.experimental.pallas import tpu as pltpu

LANES = 128
MAX_TILE_ROWS = 8192            # 8192 x 128 f32 = 4 MiB per input buffer
NUM_CORES = 2                   # v7x has 2 TCs; harmless loop split on v5e/v6e
VMEM_LIMIT_BYTES = 48 * 1024 * 1024   # < v7x's 64 MiB physical, > v5e's 16 MiB default


def _round_up(x, m):
    return ((x + m - 1) // m) * m


def _elastic_loss_kernel(pred_ref, true_ref, abs_ref, sq_ref, *,
                         tile_rows, full_rows, tiles_per_core):
    c = pl.program_id(0)                    # core / output-partial index ("parallel")
    i = pl.program_id(1)                    # row-tile index within this core ("arbitrary")
    tile_idx = c * tiles_per_core + i       # nominal (un-clamped) global tile index

    # Output blocks are resident across the i axis (block index depends only on c);
    # use them directly as small (8,128) vector accumulators.
    @pl.when(i == 0)
    def _init():
        abs_ref[...] = jnp.zeros_like(abs_ref)
        sq_ref[...] = jnp.zeros_like(sq_ref)

    sub = tile_rows // 8

    def _accumulate(diff):
        # In-tile reduction first: (tile_rows,128) -> (tile_rows//8, 8, 128) keeps the
        # (8,128) vreg tiling; sum over the non-minor leading axis is pure VPU adds.
        d3 = diff.reshape(sub, 8, LANES)
        abs_ref[0] += jnp.sum(jnp.abs(d3), axis=0)
        sq_ref[0] += jnp.sum(d3 * d3, axis=0)

    is_full = (tile_idx * tile_rows + tile_rows) <= full_rows

    # Hot path: tile lies entirely within the data -> no mask work at all.
    @pl.when(is_full)
    def _full_tile():
        _accumulate(pred_ref[...].astype(jnp.float32)
                    - true_ref[...].astype(jnp.float32))

    # Cold path: the (at most one per core) partial trailing tile, or a fully
    # out-of-range tile whose DMA index was clamped; invalid rows are zeroed so
    # they contribute nothing to either term.
    @pl.when(jnp.logical_not(is_full))
    def _tail_tile():
        row_base = tile_idx * tile_rows
        row_ids = jax.lax.broadcasted_iota(jnp.int32, (tile_rows, LANES), 0)
        valid = (row_ids + row_base) < full_rows
        diff = jnp.where(
            valid,
            pred_ref[...].astype(jnp.float32) - true_ref[...].astype(jnp.float32),
            jnp.float32(0.0),
        )
        _accumulate(diff)


def _pallas_partial_sums(pred2d, true2d):
    """Returns (sum|diff|, sum diff^2) over a (full_rows, 128) lane-dense view."""
    full_rows = pred2d.shape[0]
    tile_rows = min(MAX_TILE_ROWS, _round_up(full_rows, 8))
    num_tiles = -(-full_rows // tile_rows)
    num_cores = min(NUM_CORES, num_tiles)          # never launch a wasted core pass
    tiles_per_core = -(-num_tiles // num_cores)

    kernel = functools.partial(
        _elastic_loss_kernel,
        tile_rows=tile_rows,
        full_rows=full_rows,
        tiles_per_core=tiles_per_core,
    )

    def in_map(c, i):
        # Clamp so the DMA never starts past the end of the array; nominally
        # out-of-range tiles are fully zeroed inside the kernel (cold path).
        return (jnp.minimum(c * tiles_per_core + i, num_tiles - 1), 0)

    out_part_shape = jax.ShapeDtypeStruct((num_cores, 8, LANES), jnp.float32)

    n_kernel = full_rows * LANES
    cost = pl.CostEstimate(
        flops=5 * n_kernel,
        transcendentals=0,
        bytes_accessed=(n_kernel * (pred2d.dtype.itemsize + true2d.dtype.itemsize)
                        + 2 * num_cores * 8 * LANES * 4),
    )

    abs_part, sq_part = pl.pallas_call(
        kernel,
        out_shape=(out_part_shape, out_part_shape),
        grid_spec=pltpu.PrefetchScalarGridSpec(
            num_scalar_prefetch=0,
            grid=(num_cores, tiles_per_core),
            in_specs=[
                pl.BlockSpec((tile_rows, LANES), in_map),
                pl.BlockSpec((tile_rows, LANES), in_map),
            ],
            out_specs=[
                pl.BlockSpec((1, 8, LANES), lambda c, i: (c, 0, 0)),
                pl.BlockSpec((1, 8, LANES), lambda c, i: (c, 0, 0)),
            ],
        ),
        compiler_params=pltpu.CompilerParams(
            dimension_semantics=("parallel", "arbitrary"),
            vmem_limit_bytes=VMEM_LIMIT_BYTES,
        ),
        cost_estimate=cost,
    )(pred2d, true2d)

    return jnp.sum(abs_part), jnp.sum(sq_part)


def elastic_rmsf_loss(y_pred, y_true, l1_weight=0.5, l2_weight=0.5):
    assert y_pred.shape == y_true.shape, "y_pred and y_true must match in shape"
    n = int(y_pred.size)
    if n == 0:
        # torch's mean over an empty tensor is NaN.
        return jnp.float32(float("nan"))

    # Keep native dtype in HBM; the f32 cast happens inside the kernel.
    flat_pred = jnp.ravel(y_pred)
    flat_true = jnp.ravel(y_true)
    full_rows = n // LANES
    tail = n - full_rows * LANES

    abs_sum = jnp.float32(0.0)
    sq_sum = jnp.float32(0.0)

    if full_rows > 0:
        pred2d = flat_pred[: full_rows * LANES].reshape(full_rows, LANES)
        true2d = flat_true[: full_rows * LANES].reshape(full_rows, LANES)
        a, s = _pallas_partial_sums(pred2d, true2d)
        abs_sum = abs_sum + a
        sq_sum = sq_sum + s

    if tail > 0:
        # <128-element lane remainder: handled with plain jnp so the kernel path
        # never needs a full-array jnp.pad copy of both inputs.
        dt = (flat_pred[full_rows * LANES:].astype(jnp.float32)
              - flat_true[full_rows * LANES:].astype(jnp.float32))
        abs_sum = abs_sum + jnp.sum(jnp.abs(dt))
        sq_sum = sq_sum + jnp.sum(dt * dt)

    inv_n = jnp.float32(1.0 / n)
    return (jnp.float32(l1_weight) * abs_sum * inv_n
            + jnp.float32(l2_weight) * sq_sum * inv_n)


if __name__ == "__main__":
    key = jax.random.PRNGKey(0)
    k1, k2 = jax.random.split(key)

    # Small shapes consistent with an RMSF prediction task: (batch, channels, H, W)
    shape = (2, 4, 16, 16)
    y_pred = jax.random.normal(k1, shape, dtype=jnp.float32)
    y_true = jax.random.normal(k2, shape, dtype=jnp.float32)

    loss = elastic_rmsf_loss(y_pred, y_true, l1_weight=0.5, l2_weight=0.5)
    loss = jax.block_until_ready(loss)

    # Reference check in plain JAX (same semantics as torch F.l1_loss / F.mse_loss).
    diff = y_pred - y_true
    ref = 0.5 * jnp.mean(jnp.abs(diff)) + 0.5 * jnp.mean(diff * diff)
    assert jnp.allclose(loss, ref, rtol=1e-5, atol=1e-6), (loss, ref)

    print("KERNEL_OK")
</pallas_src>

<mosaic_0001>
module attributes {stable_mosaic.version = 11 : i64} {
  func.func @_elastic_loss_kernel(%arg0: i32, %arg1: i32, %arg2: memref<16x128xf32, #tpu.memory_space<vmem>>, %arg3: memref<16x128xf32, #tpu.memory_space<vmem>>, %arg4: memref<1x8x128xf32, #tpu.memory_space<vmem>>, %arg5: memref<1x8x128xf32, #tpu.memory_space<vmem>>) attributes {dimension_semantics = [#tpu.dimension_semantics<parallel>, #tpu.dimension_semantics<arbitrary>], iteration_bounds = array<i64: 1, 1>, scalar_prefetch = 0 : i64, scratch_operands = 0 : i64, tpu.core_type = #tpu.core_type<tc>, window_params = [{transform_indices = @transform_0, window_bounds = array<i64: 16, 128>}, {transform_indices = @transform_1, window_bounds = array<i64: 16, 128>}, {transform_indices = @transform_2, window_bounds = array<i64: 1, 8, 128>}, {transform_indices = @transform_3, window_bounds = array<i64: 1, 8, 128>}]} {
    %c1_i32 = arith.constant 1 : i32
    %0 = arith.muli %arg0, %c1_i32 : i32
    %1 = arith.addi %0, %arg1 : i32
    %c0_i32 = arith.constant 0 : i32
    %2 = arith.cmpi eq, %arg1, %c0_i32 : i32
    %3 = arith.extui %2 : i1 to i32
    %c0_i32_0 = arith.constant 0 : i32
    %4 = arith.cmpi ne, %3, %c0_i32_0 : i32
    scf.if %4 {
      %cst = arith.constant 0.000000e+00 : f32
      %13 = vector.broadcast %cst : f32 to vector<1x8x128xf32>
      %c0 = arith.constant 0 : index
      %c0_5 = arith.constant 0 : index
      %c0_6 = arith.constant 0 : index
      %14 = vector.load %arg4[%c0, %c0_5, %c0_6] : memref<1x8x128xf32, #tpu.memory_space<vmem>>, vector<1x8x128xf32>
      tpu.vector_store %arg4[%c0, %c0_5, %c0_6], %13 {strides = array<i32>} : memref<1x8x128xf32, #tpu.memory_space<vmem>>, vector<1x8x128xf32>,
      %cst_7 = arith.constant 0.000000e+00 : f32
      %15 = vector.broadcast %cst_7 : f32 to vector<1x8x128xf32>
      %c0_8 = arith.constant 0 : index
      %c0_9 = arith.constant 0 : index
      %c0_10 = arith.constant 0 : index
      %16 = vector.load %arg5[%c0_8, %c0_9, %c0_10] : memref<1x8x128xf32, #tpu.memory_space<vmem>>, vector<1x8x128xf32>
      tpu.vector_store %arg5[%c0_8, %c0_9, %c0_10], %15 {strides = array<i32>} : memref<1x8x128xf32, #tpu.memory_space<vmem>>, vector<1x8x128xf32>,
    } else {
    }
    %c16_i32 = arith.constant 16 : i32
    %5 = arith.muli %1, %c16_i32 : i32
    %c16_i32_1 = arith.constant 16 : i32
    %6 = arith.addi %5, %c16_i32_1 : i32
    %c16_i32_2 = arith.constant 16 : i32
    %7 = arith.cmpi sle, %6, %c16_i32_2 : i32
    %8 = arith.extui %7 : i1 to i32
    %c0_i32_3 = arith.constant 0 : i32
    %9 = arith.cmpi ne, %8, %c0_i32_3 : i32
    scf.if %9 {
      %c0 = arith.constant 0 : index
      %c0_5 = arith.constant 0 : index
      %13 = vector.load %arg2[%c0, %c0_5] : memref<16x128xf32, #tpu.memory_space<vmem>>, vector<16x128xf32>
      %c0_6 = arith.constant 0 : index
      %c0_7 = arith.constant 0 : index
      %14 = vector.load %arg3[%c0_6, %c0_7] : memref<16x128xf32, #tpu.memory_space<vmem>>, vector<16x128xf32>
      %15 = arith.subf %13, %14 : vector<16x128xf32>
      %16 = vector.shape_cast %15 : vector<16x128xf32> to vector<2x8x128xf32>
      %c0_8 = arith.constant 0 : index
      %c0_9 = arith.constant 0 : index
      %c0_10 = arith.constant 0 : index
      %17 = vector.load %arg4[%c0_8, %c0_9, %c0_10] : memref<1x8x128xf32, #tpu.memory_space<vmem>>, vector<1x8x128xf32>
      %18 = vector.shape_cast %17 : vector<1x8x128xf32> to vector<8x128xf32>
      %19 = math.absf %16 : vector<2x8x128xf32>
      %cst = arith.constant dense<0.000000e+00> : vector<8x128xf32>
      %20 = vector.multi_reduction <add>, %19, %cst [0] : vector<2x8x128xf32> to vector<8x128xf32>
      %21 = arith.addf %18, %20 : vector<8x128xf32>
      %c0_11 = arith.constant 0 : index
      %c0_12 = arith.constant 0 : index
      %c0_13 = arith.constant 0 : index
      %22 = vector.load %arg4[%c0_11, %c0_12, %c0_13] : memref<1x8x128xf32, #tpu.memory_space<vmem>>, vector<1x8x128xf32>
      %23 = vector.shape_cast %22 : vector<1x8x128xf32> to vector<8x128xf32>
      %24 = vector.shape_cast %21 : vector<8x128xf32> to vector<1x8x128xf32>
      tpu.vector_store %arg4[%c0_11, %c0_12, %c0_13], %24 {strides = array<i32>} : memref<1x8x128xf32, #tpu.memory_space<vmem>>, vector<1x8x128xf32>,
      %c0_14 = arith.constant 0 : index
      %c0_15 = arith.constant 0 : index
      %c0_16 = arith.constant 0 : index
      %25 = vector.load %arg5[%c0_14, %c0_15, %c0_16] : memref<1x8x128xf32, #tpu.memory_space<vmem>>, vector<1x8x128xf32>
      %26 = vector.shape_cast %25 : vector<1x8x128xf32> to vector<8x128xf32>
      %27 = arith.mulf %16, %16 : vector<2x8x128xf32>
      %cst_17 = arith.constant dense<0.000000e+00> : vector<8x128xf32>
      %28 = vector.multi_reduction <add>, %27, %cst_17 [0] : vector<2x8x128xf32> to vector<8x128xf32>
      %29 = arith.addf %26, %28 : vector<8x128xf32>
      %c0_18 = arith.constant 0 : index
      %c0_19 = arith.constant 0 : index
      %c0_20 = arith.constant 0 : index
      %30 = vector.load %arg5[%c0_18, %c0_19, %c0_20] : memref<1x8x128xf32, #tpu.memory_space<vmem>>, vector<1x8x128xf32>
      %31 = vector.shape_cast %30 : vector<1x8x128xf32> to vector<8x128xf32>
      %32 = vector.shape_cast %29 : vector<8x128xf32> to vector<1x8x128xf32>
      tpu.vector_store %arg5[%c0_18, %c0_19, %c0_20], %32 {strides = array<i32>} : memref<1x8x128xf32, #tpu.memory_space<vmem>>, vector<1x8x128xf32>,
    } else {
    }
    %true = arith.constant true
    %10 = arith.xori %7, %true : i1
    %11 = arith.extui %10 : i1 to i32
    %c0_i32_4 = arith.constant 0 : i32
    %12 = arith.cmpi ne, %11, %c0_i32_4 : i32
    scf.if %12 {
      %c16_i32_5 = arith.constant 16 : i32
      %13 = arith.muli %1, %c16_i32_5 : i32
      %14 = tpu.iota {dimensions = array<i32: 0>} : vector<16x128xi32>
      %15 = vector.broadcast %13 : i32 to vector<16x128xi32>
      %16 = arith.addi %14, %15 : vector<16x128xi32>
      %c16_i32_6 = arith.constant 16 : i32
      %17 = vector.broadcast %c16_i32_6 : i32 to vector<16x128xi32>
      %18 = arith.cmpi slt, %16, %17 : vector<16x128xi32>
      %c0 = arith.constant 0 : index
      %c0_7 = arith.constant 0 : index
      %19 = vector.load %arg2[%c0, %c0_7] : memref<16x128xf32, #tpu.memory_space<vmem>>, vector<16x128xf32>
      %c0_8 = arith.constant 0 : index
      %c0_9 = arith.constant 0 : index
      %20 = vector.load %arg3[%c0_8, %c0_9] : memref<16x128xf32, #tpu.memory_space<vmem>>, vector<16x128xf32>
      %21 = arith.subf %19, %20 : vector<16x128xf32>
      %cst = arith.constant 0.000000e+00 : f32
      %22 = vector.broadcast %cst : f32 to vector<16x128xf32>
      %23 = arith.select %18, %21, %22 : vector<16x128xi1>, vector<16x128xf32>
      %24 = vector.shape_cast %23 : vector<16x128xf32> to vector<2x8x128xf32>
      %c0_10 = arith.constant 0 : index
      %c0_11 = arith.constant 0 : index
      %c0_12 = arith.constant 0 : index
      %25 = vector.load %arg4[%c0_10, %c0_11, %c0_12] : memref<1x8x128xf32, #tpu.memory_space<vmem>>, vector<1x8x128xf32>
      %26 = vector.shape_cast %25 : vector<1x8x128xf32> to vector<8x128xf32>
      %27 = math.absf %24 : vector<2x8x128xf32>
      %cst_13 = arith.constant dense<0.000000e+00> : vector<8x128xf32>
      %28 = vector.multi_reduction <add>, %27, %cst_13 [0] : vector<2x8x128xf32> to vector<8x128xf32>
      %29 = arith.addf %26, %28 : vector<8x128xf32>
      %c0_14 = arith.constant 0 : index
      %c0_15 = arith.constant 0 : index
      %c0_16 = arith.constant 0 : index
      %30 = vector.load %arg4[%c0_14, %c0_15, %c0_16] : memref<1x8x128xf32, #tpu.memory_space<vmem>>, vector<1x8x128xf32>
      %31 = vector.shape_cast %30 : vector<1x8x128xf32> to vector<8x128xf32>
      %32 = vector.shape_cast %29 : vector<8x128xf32> to vector<1x8x128xf32>
      tpu.vector_store %arg4[%c0_14, %c0_15, %c0_16], %32 {strides = array<i32>} : memref<1x8x128xf32, #tpu.memory_space<vmem>>, vector<1x8x128xf32>,
      %c0_17 = arith.constant 0 : index
      %c0_18 = arith.constant 0 : index
      %c0_19 = arith.constant 0 : index
      %33 = vector.load %arg5[%c0_17, %c0_18, %c0_19] : memref<1x8x128xf32, #tpu.memory_space<vmem>>, vector<1x8x128xf32>
      %34 = vector.shape_cast %33 : vector<1x8x128xf32> to vector<8x128xf32>
      %35 = arith.mulf %24, %24 : vector<2x8x128xf32>
      %cst_20 = arith.constant dense<0.000000e+00> : vector<8x128xf32>
      %36 = vector.multi_reduction <add>, %35, %cst_20 [0] : vector<2x8x128xf32> to vector<8x128xf32>
      %37 = arith.addf %34, %36 : vector<8x128xf32>
      %c0_21 = arith.constant 0 : index
      %c0_22 = arith.constant 0 : index
      %c0_23 = arith.constant 0 : index
      %38 = vector.load %arg5[%c0_21, %c0_22, %c0_23] : memref<1x8x128xf32, #tpu.memory_space<vmem>>, vector<1x8x128xf32>
      %39 = vector.shape_cast %38 : vector<1x8x128xf32> to vector<8x128xf32>
      %40 = vector.shape_cast %37 : vector<8x128xf32> to vector<1x8x128xf32>
      tpu.vector_store %arg5[%c0_21, %c0_22, %c0_23], %40 {strides = array<i32>} : memref<1x8x128xf32, #tpu.memory_space<vmem>>, vector<1x8x128xf32>,
    } else {
    }
    return
  }
  func.func @transform_0(%arg0: i32, %arg1: i32) -> (i32, i32) {
    %c1_i32 = arith.constant 1 : i32
    %0 = arith.muli %arg0, %c1_i32 : i32
    %1 = arith.addi %0, %arg1 : i32
    %c0_i32 = arith.constant 0 : i32
    %2 = arith.minsi %1, %c0_i32 : i32
    %c0_i32_0 = arith.constant 0 : i32
    %c0_i32_1 = arith.constant 0 : i32
    return %2, %c0_i32_0 : i32, i32
  }
  func.func @transform_1(%arg0: i32, %arg1: i32) -> (i32, i32) {
    %c1_i32 = arith.constant 1 : i32
    %0 = arith.muli %arg0, %c1_i32 : i32
    %1 = arith.addi %0, %arg1 : i32
    %c0_i32 = arith.constant 0 : i32
    %2 = arith.minsi %1, %c0_i32 : i32
    %c0_i32_0 = arith.constant 0 : i32
    %c0_i32_1 = arith.constant 0 : i32
    return %2, %c0_i32_0 : i32, i32
  }
  func.func @transform_2(%arg0: i32, %arg1: i32) -> (i32, i32, i32) {
    %c0_i32 = arith.constant 0 : i32
    %c0_i32_0 = arith.constant 0 : i32
    %c0_i32_1 = arith.constant 0 : i32
    return %arg0, %c0_i32, %c0_i32_0 : i32, i32, i32
  }
  func.func @transform_3(%arg0: i32, %arg1: i32) -> (i32, i32, i32) {
    %c0_i32 = arith.constant 0 : i32
    %c0_i32_0 = arith.constant 0 : i32
    %c0_i32_1 = arith.constant 0 : i32
    return %arg0, %c0_i32, %c0_i32_0 : i32, i32, i32
  }
}

</mosaic_0001>

<bundles_post_ra>
// kernel: tpu_custom_call.1
= control target key start
LH: loop header
LB: loop body
LE: loop exit
PB: predicated region body
PF: predicated region fallthrough
CT: control target
= control target key end

     0   :  { %9 = vsyncpa [#allocation3], 0  ;;  %s337_s0 = inlined_call_operand.hbm [shape: f32[16,128], index: 0, kind: input, shape index: {}]   ;;  %s338_s1 = inlined_call_operand.hbm [shape: f32[16,128], index: 1, kind: input, shape index: {}]   ;;  %s339_s2 = inlined_call_operand.hbm [shape: f32[1,8,128], index: 2, kind: output, shape index: {0}]   ;;  %s340_s3 = inlined_call_operand.hbm [shape: f32[1,8,128], index: 3, kind: output, shape index: {1}]  }
   0x1   :  { %10 = vsyncpa [#allocation6], 0 }
   0x2   :  { %11 = vsyncpa [#allocation4], 0 }
   0x3   :  { %12 = vsyncpa [#allocation9], 0  ;;  %s263_s12 = smov [#allocation2]   ;;  %s167_s16 = scalar_lea.hbm %s337_s0, 256 }
   0x4   :  { %s24_s13 = sshll.u32 %s263_s12, 4  ;;  %p168_p0 = scmp.ne.s32.totalorder %s337_s0, %s167_s16  ;;  %s25_s13 = int_to_ptr.vmem [resolvable:$true] %s24_s13 }
   0x5   :  { %p171_p1 = scmp.lt.u32.totalorder %s167_s16, %s337_s0 }
   0x7   :  { %p173_p2 = pnand %p171_p1, %p168_p0 }
   0x9   :  { %176 = shalt.err (!%p173_p2)
}
   0xa   :  { %s177_s21 = scalar_lea.vmem %s25_s13, 256  ;;  %p182_p4 = scmp.lt.s32.totalorder %s25_s13, %s25_s13 }
   0xb   :  { %p178_p3 = scmp.ne.s32.totalorder %s25_s13, %s177_s21  ;;  %p183_p5 = scmp.lt.s32.totalorder %s177_s21, %s177_s21 }
   0xd   :  { %p184_p6 = por %p183_p5, %p182_p4 }
   0xf   :  { %p185_p7 = pnand %p184_p6, %p178_p3 }
  0x11   :  { %188 = shalt.err (!%p185_p7)
}
  0x12   :  { %s264_s22 = smov 128   ;;  %s265_s23 = smov 8  }
  0x13   :  { %30 = dma.hbm_to_vmem [thread:$0]  %s337_s0, 256, %s25_s13, [#allocation3], %s264_s22, %s264_s22, %s265_s23  }
  0x14   :  { %s266_s26 = smov [#allocation5]   ;;  %s189_s30 = scalar_lea.hbm %s338_s1, 256 }
  0x15   :  { %s42_s27 = sshll.u32 %s266_s26, 4  ;;  %p190_p8 = scmp.ne.s32.totalorder %s338_s1, %s189_s30  ;;  %s43_s27 = int_to_ptr.vmem [resolvable:$true] %s42_s27 }
  0x16   :  { %p193_p9 = scmp.lt.u32.totalorder %s189_s30, %s338_s1 }
  0x18   :  { %p195_p10 = pnand %p193_p9, %p190_p8 }
  0x1a   :  { %198 = shalt.err (!%p195_p10)
}
  0x1b   :  { %s199_s8 = scalar_lea.vmem %s43_s27, 256  ;;  %p204_p12 = scmp.lt.s32.totalorder %s43_s27, %s43_s27 }
  0x1c   :  { %p200_p11 = scmp.ne.s32.totalorder %s43_s27, %s199_s8  ;;  %p205_p13 = scmp.lt.s32.totalorder %s199_s8, %s199_s8 }
  0x1e   :  { %p206_p0 = por %p205_p13, %p204_p12 }
  0x20   :  { %p207_p1 = pnand %p206_p0, %p200_p11 }
  0x22   :  { %210 = shalt.err (!%p207_p1)
}
  0x23   :  { %48 = dma.hbm_to_vmem [thread:$0]  %s338_s1, 256, %s43_s27, [#allocation6], %s264_s22, %s264_s22, %s265_s23  }
  0x24   :  { %255 = dma.done.wait [#allocation3], 256  }
  0x25   :  { %256 = vsyncadd [#allocation3], 4294967040 }
  0x26   :  { %257 = dma.done.wait [#allocation6], 256  }
  0x27   :  { %258 = vsyncadd [#allocation6], 4294967040  ;;  %v76_v0 = vld [vmem:[#allocation2] sm:$0xff]  ;;  %v77_v1 = vld [vmem:[#allocation2 + $0x8] sm:$0xff]  ;;  %s267_s10 = smov [#allocation7]   ;;  %s268_s12 = smov [#allocation8]  }
  0x28   :  { %v78_v2 = vld [vmem:[#allocation5] sm:$0xff]  ;;  %v79_v3 = vld [vmem:[#allocation5 + $0x8] sm:$0xff]  ;;  %s132_s11 = sshll.u32 %s267_s10, 4  ;;  %s142_s1 = sshll.u32 %s268_s12, 4  ;;  %s133_s11 = int_to_ptr.vmem [resolvable:$true] %s132_s11  ;;  %s143_s1 = int_to_ptr.vmem [resolvable:$true] %s142_s1 }
  0x29   :  { %v80_v4 = vsub.f32 %v76_v0, %v78_v2  ;;  %v81_v5 = vsub.f32 %v77_v1, %v79_v3  ;;  %s211_s13 = scalar_lea.vmem %s133_s11, 128  ;;  %p216_p3 = scmp.lt.s32.totalorder %s133_s11, %s133_s11 }
  0x2a   :  { %p212_p2 = scmp.ne.s32.totalorder %s133_s11, %s211_s13  ;;  %p217_p4 = scmp.lt.s32.totalorder %s211_s13, %s211_s13 }
  0x2b   :  { %v83_v6 = vand.u32 2147483647, %v80_v4  ;;  %v89_v7 = vmul.f32 %v80_v4, %v80_v4  ;;  %v84_v8 = vand.u32 2147483647, %v81_v5  ;;  %v90_v9 = vmul.f32 %v81_v5, %v81_v5 }
  0x2c   :  { %p218_p5 = por %p217_p4, %p216_p3 }
  0x2d   :  { %v85_v10 = vadd.f32 %v84_v8, %v83_v6  ;;  %v91_v11 = vadd.f32 %v90_v9, %v89_v7 }
  0x2e   :  { %p219_p6 = pnand %p218_p5, %p212_p2 }
  0x2f   :  { %87 = vst [vmem:[#allocation7] sm:$0xff] %v85_v10  ;;  %93 = vst [vmem:[#allocation8] sm:$0xff] %v91_v11 }
  0x30   :  { %222 = shalt.err (!%p219_p6)
}
  0x31   :  { %s223_s16 = scalar_lea.hbm %s339_s2, 128 }
  0x32   :  { %p224_p7 = scmp.ne.s32.totalorder %s339_s2, %s223_s16  ;;  %p227_p8 = scmp.lt.u32.totalorder %s223_s16, %s339_s2 }
  0x34   :  { %p229_p9 = pnand %p227_p8, %p224_p7 }
  0x36   :  { %232 = shalt.err (!%p229_p9)
}
  0x37   :  { %135 = dma.vmem_to_hbm [thread:$0]  %s133_s11, 128, %s339_s2, [#allocation4]  }
  0x38   :  { %s233_s23 = scalar_lea.vmem %s143_s1, 128  ;;  %p238_p11 = scmp.lt.s32.totalorder %s143_s1, %s143_s1 }
  0x39   :  { %p234_p10 = scmp.ne.s32.totalorder %s143_s1, %s233_s23  ;;  %p239_p12 = scmp.lt.s32.totalorder %s233_s23, %s233_s23 }
  0x3b   :  { %p240_p13 = por %p239_p12, %p238_p11 }
  0x3d   :  { %p241_p0 = pnand %p240_p13, %p234_p10 }
  0x3f   :  { %244 = shalt.err (!%p241_p0)
}
  0x40   :  { %s245_s26 = scalar_lea.hbm %s340_s3, 128 }
  0x41   :  { %p246_p1 = scmp.ne.s32.totalorder %s340_s3, %s245_s26  ;;  %p249_p2 = scmp.lt.u32.totalorder %s245_s26, %s340_s3 }
  0x43   :  { %p251_p3 = pnand %p249_p2, %p246_p1 }
  0x45   :  { %254 = shalt.err (!%p251_p3)
}
  0x46   :  { %145 = dma.vmem_to_hbm [thread:$0]  %s143_s1, 128, %s340_s3, [#allocation9]  }
  0x47   :  { %259 = dma.done.wait [#allocation4], 128  }
  0x48   :  { %260 = vsyncadd [#allocation4], 4294967168 }
  0x49   :  { %261 = dma.done.wait [#allocation9], 128  }
  0x4a   :  { %262 = vsyncadd [#allocation9], 4294967168 }
  0x4b   :  { %152 = vsyncpa [#allocation3], 1 }
  0x4c   :  { %153 = vsyncpa [#allocation6], 1 }
  0x4d   :  { %154 = vsyncpa [#allocation4], 1 }
  0x4e   :  { %155 = vsyncpa [#allocation9], 1 }

</bundles_post_ra>
